<compile_context>
chip_gen: v7x
topology: tpu7x:2x2x1
jax: 0.10.0
libtpu: 0.0.40
codegen_flags: <defaults>
</compile_context>

<pallas_src>
import functools
import numpy as np
import jax
import jax.numpy as jnp
from jax.experimental import pallas as pl
from jax.experimental.pallas import tpu as pltpu


def _nlsa_kernel(x_ref, wqkv_ref, bqkv_ref, bias_ref, wproj_ref, bproj_ref, o_ref,
                 *, num_heads, head_dim):
    # x_ref block: (TB, N, C); weights/bias are full (pipeline-invariant) arrays.
    TB, N, C = x_ref.shape
    cd = x_ref.dtype                          # MXU operand dtype (bf16 if caller feeds bf16)

    # Flatten windows*tokens into one big M dimension (leading-dim merge only; minor dims
    # unchanged, so this is layout preserving).
    x2 = x_ref[...].reshape(TB * N, C)

    # Fused QKV projection for the whole block. `scale` is pre-folded into the q columns
    # of the weight/bias at parameter-prep time, so there is no in-kernel q*scale multiply.
    qkv = jnp.dot(x2, wqkv_ref[...].astype(cd), preferred_element_type=jnp.float32)
    qkv = qkv + bqkv_ref[...].astype(jnp.float32)            # (TB*N, 3C), f32

    y = None
    for h in range(num_heads):                # static unroll: num_heads is small
        lo = h * head_dim
        q = qkv[:, lo:lo + head_dim].astype(cd).reshape(TB, N, head_dim)
        k = qkv[:, C + lo:C + lo + head_dim].astype(cd).reshape(TB, N, head_dim)
        v = qkv[:, 2 * C + lo:2 * C + lo + head_dim].astype(cd).reshape(TB, N, head_dim)

        # Logits for all TB windows of this head at once: (TB, N, N), f32.
        s = jnp.einsum('bqd,bkd->bqk', q, k, preferred_element_type=jnp.float32)
        s = s + bias_ref[h].astype(jnp.float32)               # (N, N) broadcasts over TB

        # Softmax over keys in f32; reciprocal goes to the EUP slot (frees the VALU).
        m = jnp.max(s, axis=-1, keepdims=True)
        e = jnp.exp(s - m)
        p = e * pl.reciprocal(jnp.sum(e, axis=-1, keepdims=True), approx=True)

        ctx = jnp.einsum('bqk,bkd->bqd', p.astype(cd), v,
                         preferred_element_type=jnp.float32)  # (TB, N, hd)
        ctx2 = ctx.reshape(TB * N, head_dim).astype(cd)

        # Accumulate the output projection head-by-head (no concatenate needed):
        # out @ Wp == sum_h ctx_h @ Wp[h*hd:(h+1)*hd, :].
        wp_h = wproj_ref[lo:lo + head_dim, :].astype(cd)      # (hd, C), sublane-aligned slice
        contrib = jnp.dot(ctx2, wp_h, preferred_element_type=jnp.float32)
        y = contrib if y is None else y + contrib

    y = y + bproj_ref[...].astype(jnp.float32)                # (1, C) broadcast
    o_ref[...] = y.reshape(TB, N, C).astype(o_ref.dtype)


def _relative_position_bias(table, window_size, num_heads):
    """Builds the (H, N, N) relative position bias from the learned table (host-side glue)."""
    Wh, Ww = window_size
    N = Wh * Ww
    coords = np.stack(np.meshgrid(np.arange(Wh), np.arange(Ww), indexing="ij"))  # (2, Wh, Ww)
    coords_flatten = coords.reshape(2, -1)                                       # (2, N)
    rel = coords_flatten[:, :, None] - coords_flatten[:, None, :]                # (2, N, N)
    rel = rel.transpose(1, 2, 0).astype(np.int32)                                # (N, N, 2)
    rel[:, :, 0] += Wh - 1
    rel[:, :, 1] += Ww - 1
    rel[:, :, 0] *= 2 * Ww - 1
    rel_index = rel.sum(-1)                                                      # (N, N)
    bias = jnp.take(table, jnp.asarray(rel_index.reshape(-1)), axis=0)           # (N*N, H)
    return bias.reshape(N, N, num_heads).transpose(2, 0, 1)                      # (H, N, N)


def nlsa_forward(x, params, window_size, num_heads, qk_scale=None, block_windows=32):
    """x: (B_, N, C) with N == Wh*Ww. mask is None (see TODO above)."""
    B_, N, C = x.shape
    assert N == window_size[0] * window_size[1]
    head_dim = C // num_heads
    scale = qk_scale if qk_scale is not None else head_dim ** (-0.5)

    bias = _relative_position_bias(params["relative_position_bias_table"],
                                   window_size, num_heads)

    # Weights in (in, out) layout so the kernel does x @ W.  Fold the qk scale into the
    # q columns of the qkv weight/bias (one-time host-side prep).
    w_qkv = params["qkv_weight"].T                                       # (C, 3C)
    w_qkv = jnp.concatenate([w_qkv[:, :C] * scale, w_qkv[:, C:]], axis=1)
    b_qkv = params["qkv_bias"]
    b_qkv = jnp.concatenate([b_qkv[:C] * scale, b_qkv[C:]]).reshape(1, 3 * C)
    w_proj = params["proj_weight"].T                                     # (C, C)
    b_proj = params["proj_bias"].reshape(1, C)

    # Batch many windows per grid step; keep >= 2 grid steps when possible so both v7x
    # TensorCores get work.  block_windows is sweepable (32..512) depending on generation.
    tb = max(1, min(block_windows, B_))
    if B_ >= 2:
        tb = min(tb, -(-B_ // 2))
    num_blocks = -(-B_ // tb)
    B_pad = num_blocks * tb
    x_p = jnp.pad(x, ((0, B_pad - B_), (0, 0), (0, 0))) if B_pad != B_ else x

    kernel = functools.partial(_nlsa_kernel, num_heads=num_heads, head_dim=head_dim)

    out = pl.pallas_call(
        kernel,
        out_shape=jax.ShapeDtypeStruct((B_pad, N, C), x.dtype),
        grid_spec=pltpu.PrefetchScalarGridSpec(
            num_scalar_prefetch=0,
            grid=(num_blocks,),
            in_specs=[
                pl.BlockSpec((tb, N, C), lambda b: (b, 0, 0)),           # x
                pl.BlockSpec((C, 3 * C), lambda b: (0, 0)),              # qkv weight (scale folded)
                pl.BlockSpec((1, 3 * C), lambda b: (0, 0)),              # qkv bias (scale folded)
                pl.BlockSpec((num_heads, N, N), lambda b: (0, 0, 0)),    # rel-pos bias
                pl.BlockSpec((C, C), lambda b: (0, 0)),                  # proj weight
                pl.BlockSpec((1, C), lambda b: (0, 0)),                  # proj bias
            ],
            out_specs=pl.BlockSpec((tb, N, C), lambda b: (b, 0, 0)),
        ),
        compiler_params=pltpu.CompilerParams(
            dimension_semantics=("parallel",),
            vmem_limit_bytes=32 * 1024 * 1024,
        ),
    )(x_p, w_qkv, b_qkv, bias, w_proj, b_proj)

    return out[:B_] if B_pad != B_ else out


def _reference(x, params, window_size, num_heads, qk_scale=None):
    """Pure-JAX reference matching the PyTorch module (mask=None, eval mode)."""
    B_, N, C = x.shape
    hd = C // num_heads
    scale = qk_scale if qk_scale is not None else hd ** (-0.5)
    bias = _relative_position_bias(params["relative_position_bias_table"],
                                   window_size, num_heads)
    qkv = jnp.einsum("bnc,dc->bnd", x, params["qkv_weight"]) + params["qkv_bias"]
    qkv = qkv.reshape(B_, N, 3, num_heads, hd).transpose(2, 0, 3, 1, 4)
    q, k, v = qkv[0], qkv[1], qkv[2]
    attn = (q * scale) @ jnp.swapaxes(k, -2, -1) + bias[None]
    attn = jax.nn.softmax(attn, axis=-1)
    out = (attn @ v).transpose(0, 2, 1, 3).reshape(B_, N, C)
    return jnp.einsum("bnc,dc->bnd", out, params["proj_weight"]) + params["proj_bias"]


if __name__ == "__main__":
    # Shapes consistent with the module: dim=32, window 4x4 -> N=16, heads=4.
    dim = 32
    window_size = (4, 4)
    num_heads = 4
    N = window_size[0] * window_size[1]

    key = jax.random.PRNGKey(0)
    k1, k2, k3, k4, k5, k6, k7 = jax.random.split(key, 7)

    params = {
        # trunc_normal(std=0.02) approximated by normal*0.02 (deterministic synthetic init)
        "relative_position_bias_table": 0.02 * jax.random.normal(
            k1, ((2 * window_size[0] - 1) * (2 * window_size[1] - 1), num_heads), jnp.float32),
        "qkv_weight": 0.1 * jax.random.normal(k2, (3 * dim, dim), jnp.float32),   # PyTorch (out,in)
        "qkv_bias": 0.1 * jax.random.normal(k3, (3 * dim,), jnp.float32),
        "proj_weight": 0.1 * jax.random.normal(k4, (dim, dim), jnp.float32),
        "proj_bias": 0.1 * jax.random.normal(k5, (dim,), jnp.float32),
    }

    # Small case (B_=2) and a larger case that exercises multi-window blocks + padding.
    for B_, kx in ((2, k6), (200, k7)):
        x = jax.random.normal(kx, (B_, N, dim), jnp.float32)
        out = jax.block_until_ready(nlsa_forward(x, params, window_size, num_heads))
        ref = _reference(x, params, window_size, num_heads)
        np.testing.assert_allclose(np.asarray(out), np.asarray(ref), rtol=2e-3, atol=2e-3)

    print("KERNEL_OK")
</pallas_src>

<mosaic_0001>
module attributes {stable_mosaic.version = 11 : i64} {
  func.func @_nlsa_kernel(%arg0: i32, %arg1: memref<1x16x32xf32, #tpu.memory_space<vmem>>, %arg2: memref<32x96xf32, #tpu.memory_space<vmem>>, %arg3: memref<1x96xf32, #tpu.memory_space<vmem>>, %arg4: memref<4x16x16xf32, #tpu.memory_space<vmem>>, %arg5: memref<32x32xf32, #tpu.memory_space<vmem>>, %arg6: memref<1x32xf32, #tpu.memory_space<vmem>>, %arg7: memref<1x16x32xf32, #tpu.memory_space<vmem>>) attributes {dimension_semantics = [#tpu.dimension_semantics<parallel>], iteration_bounds = array<i64: 2>, scalar_prefetch = 0 : i64, scratch_operands = 0 : i64, tpu.core_type = #tpu.core_type<tc>, window_params = [{transform_indices = @transform_0, window_bounds = array<i64: 1, 16, 32>}, {pipeline_mode = #tpu.pipeline_mode<synchronous>, transform_indices = @transform_1, window_bounds = array<i64: 32, 96>}, {pipeline_mode = #tpu.pipeline_mode<synchronous>, transform_indices = @transform_2, window_bounds = array<i64: 1, 96>}, {pipeline_mode = #tpu.pipeline_mode<synchronous>, transform_indices = @transform_3, window_bounds = array<i64: 4, 16, 16>}, {pipeline_mode = #tpu.pipeline_mode<synchronous>, transform_indices = @transform_4, window_bounds = array<i64: 32, 32>}, {pipeline_mode = #tpu.pipeline_mode<synchronous>, transform_indices = @transform_5, window_bounds = array<i64: 1, 32>}, {transform_indices = @transform_6, window_bounds = array<i64: 1, 16, 32>}]} {
    %c0 = arith.constant 0 : index
    %c0_0 = arith.constant 0 : index
    %c0_1 = arith.constant 0 : index
    %0 = vector.load %arg1[%c0, %c0_0, %c0_1] : memref<1x16x32xf32, #tpu.memory_space<vmem>>, vector<1x16x32xf32>
    %1 = vector.shape_cast %0 : vector<1x16x32xf32> to vector<16x32xf32>
    %c0_2 = arith.constant 0 : index
    %c0_3 = arith.constant 0 : index
    %2 = vector.load %arg2[%c0_2, %c0_3] : memref<32x96xf32, #tpu.memory_space<vmem>>, vector<32x96xf32>
    %cst = arith.constant dense<0.000000e+00> : vector<16x96xf32>
    %3 = tpu.matmul %1, %2, %cst {dimension_numbers = #tpu.dot_dimension_numbers<[1], [0], [0], [1], [0, 0, 1, 1], [], []>} : vector<16x32xf32>, vector<32x96xf32>, vector<16x96xf32> -> vector<16x96xf32>
    %c0_4 = arith.constant 0 : index
    %c0_5 = arith.constant 0 : index
    %4 = vector.load %arg3[%c0_4, %c0_5] : memref<1x96xf32, #tpu.memory_space<vmem>>, vector<1x96xf32>
    %5 = vector.broadcast %4 : vector<1x96xf32> to vector<16x96xf32>
    %6 = arith.addf %3, %5 : vector<16x96xf32>
    %7 = vector.extract_strided_slice %6 {offsets = [0, 0], sizes = [16, 8], strides = [1, 1]} : vector<16x96xf32> to vector<16x8xf32>
    %8 = vector.shape_cast %7 : vector<16x8xf32> to vector<1x16x8xf32>
    %9 = vector.extract_strided_slice %6 {offsets = [0, 32], sizes = [16, 8], strides = [1, 1]} : vector<16x96xf32> to vector<16x8xf32>
    %10 = vector.shape_cast %9 : vector<16x8xf32> to vector<1x16x8xf32>
    %11 = vector.extract_strided_slice %6 {offsets = [0, 64], sizes = [16, 8], strides = [1, 1]} : vector<16x96xf32> to vector<16x8xf32>
    %12 = vector.shape_cast %11 : vector<16x8xf32> to vector<1x16x8xf32>
    "tpu.trace_start"() <{level = 10 : i32, message = "bqd,bkd->bqk"}> : () -> ()
    %cst_6 = arith.constant dense<0.000000e+00> : vector<1x16x16xf32>
    %13 = tpu.matmul %8, %10, %cst_6 {dimension_numbers = #tpu.dot_dimension_numbers<[2], [2], [1], [1], [0, 0, 0, 1, 1, 1], [0], [0]>} : vector<1x16x8xf32>, vector<1x16x8xf32>, vector<1x16x16xf32> -> vector<1x16x16xf32>
    "tpu.trace_stop"() : () -> ()
    %c0_7 = arith.constant 0 : index
    %c0_8 = arith.constant 0 : index
    %c0_9 = arith.constant 0 : index
    %14 = vector.load %arg4[%c0_7, %c0_8, %c0_9] : memref<4x16x16xf32, #tpu.memory_space<vmem>>, vector<1x16x16xf32>
    %15 = vector.shape_cast %14 : vector<1x16x16xf32> to vector<16x16xf32>
    %16 = vector.shape_cast %15 : vector<16x16xf32> to vector<1x16x16xf32>
    %17 = arith.addf %13, %16 : vector<1x16x16xf32>
    %cst_10 = arith.constant dense<0xFF800000> : vector<1x16xf32>
    %18 = vector.multi_reduction <maximumf>, %17, %cst_10 [2] : vector<1x16x16xf32> to vector<1x16xf32>
    %19 = vector.shape_cast %18 : vector<1x16xf32> to vector<1x16x1xf32>
    %20 = vector.broadcast %19 : vector<1x16x1xf32> to vector<1x16x16xf32>
    %21 = arith.subf %17, %20 : vector<1x16x16xf32>
    %22 = math.exp %21 : vector<1x16x16xf32>
    %cst_11 = arith.constant dense<0.000000e+00> : vector<1x16xf32>
    %23 = vector.multi_reduction <add>, %22, %cst_11 [2] : vector<1x16x16xf32> to vector<1x16xf32>
    %24 = vector.shape_cast %23 : vector<1x16xf32> to vector<1x16x1xf32>
    %25 = tpu.reciprocal %24 {approx = true} : vector<1x16x1xf32> -> vector<1x16x1xf32>
    %26 = vector.broadcast %25 : vector<1x16x1xf32> to vector<1x16x16xf32>
    %27 = arith.mulf %22, %26 : vector<1x16x16xf32>
    "tpu.trace_start"() <{level = 10 : i32, message = "bqk,bkd->bqd"}> : () -> ()
    %cst_12 = arith.constant dense<0.000000e+00> : vector<1x16x8xf32>
    %28 = tpu.matmul %27, %12, %cst_12 {dimension_numbers = #tpu.dot_dimension_numbers<[2], [1], [1], [2], [0, 0, 0, 1, 1, 2], [0], [0]>} : vector<1x16x16xf32>, vector<1x16x8xf32>, vector<1x16x8xf32> -> vector<1x16x8xf32>
    "tpu.trace_stop"() : () -> ()
    %29 = vector.shape_cast %28 : vector<1x16x8xf32> to vector<16x8xf32>
    %c0_13 = arith.constant 0 : index
    %c0_14 = arith.constant 0 : index
    %30 = vector.load %arg5[%c0_13, %c0_14] : memref<32x32xf32, #tpu.memory_space<vmem>>, vector<8x32xf32>
    %cst_15 = arith.constant dense<0.000000e+00> : vector<16x32xf32>
    %31 = tpu.matmul %29, %30, %cst_15 {dimension_numbers = #tpu.dot_dimension_numbers<[1], [0], [0], [1], [0, 0, 1, 1], [], []>} : vector<16x8xf32>, vector<8x32xf32>, vector<16x32xf32> -> vector<16x32xf32>
    %32 = vector.extract_strided_slice %6 {offsets = [0, 8], sizes = [16, 8], strides = [1, 1]} : vector<16x96xf32> to vector<16x8xf32>
    %33 = vector.shape_cast %32 : vector<16x8xf32> to vector<1x16x8xf32>
    %34 = vector.extract_strided_slice %6 {offsets = [0, 40], sizes = [16, 8], strides = [1, 1]} : vector<16x96xf32> to vector<16x8xf32>
    %35 = vector.shape_cast %34 : vector<16x8xf32> to vector<1x16x8xf32>
    %36 = vector.extract_strided_slice %6 {offsets = [0, 72], sizes = [16, 8], strides = [1, 1]} : vector<16x96xf32> to vector<16x8xf32>
    %37 = vector.shape_cast %36 : vector<16x8xf32> to vector<1x16x8xf32>
    "tpu.trace_start"() <{level = 10 : i32, message = "bqd,bkd->bqk"}> : () -> ()
    %cst_16 = arith.constant dense<0.000000e+00> : vector<1x16x16xf32>
    %38 = tpu.matmul %33, %35, %cst_16 {dimension_numbers = #tpu.dot_dimension_numbers<[2], [2], [1], [1], [0, 0, 0, 1, 1, 1], [0], [0]>} : vector<1x16x8xf32>, vector<1x16x8xf32>, vector<1x16x16xf32> -> vector<1x16x16xf32>
    "tpu.trace_stop"() : () -> ()
    %c1 = arith.constant 1 : index
    %c0_17 = arith.constant 0 : index
    %c0_18 = arith.constant 0 : index
    %39 = vector.load %arg4[%c1, %c0_17, %c0_18] : memref<4x16x16xf32, #tpu.memory_space<vmem>>, vector<1x16x16xf32>
    %40 = vector.shape_cast %39 : vector<1x16x16xf32> to vector<16x16xf32>
    %41 = vector.shape_cast %40 : vector<16x16xf32> to vector<1x16x16xf32>
    %42 = arith.addf %38, %41 : vector<1x16x16xf32>
    %cst_19 = arith.constant dense<0xFF800000> : vector<1x16xf32>
    %43 = vector.multi_reduction <maximumf>, %42, %cst_19 [2] : vector<1x16x16xf32> to vector<1x16xf32>
    %44 = vector.shape_cast %43 : vector<1x16xf32> to vector<1x16x1xf32>
    %45 = vector.broadcast %44 : vector<1x16x1xf32> to vector<1x16x16xf32>
    %46 = arith.subf %42, %45 : vector<1x16x16xf32>
    %47 = math.exp %46 : vector<1x16x16xf32>
    %cst_20 = arith.constant dense<0.000000e+00> : vector<1x16xf32>
    %48 = vector.multi_reduction <add>, %47, %cst_20 [2] : vector<1x16x16xf32> to vector<1x16xf32>
    %49 = vector.shape_cast %48 : vector<1x16xf32> to vector<1x16x1xf32>
    %50 = tpu.reciprocal %49 {approx = true} : vector<1x16x1xf32> -> vector<1x16x1xf32>
    %51 = vector.broadcast %50 : vector<1x16x1xf32> to vector<1x16x16xf32>
    %52 = arith.mulf %47, %51 : vector<1x16x16xf32>
    "tpu.trace_start"() <{level = 10 : i32, message = "bqk,bkd->bqd"}> : () -> ()
    %cst_21 = arith.constant dense<0.000000e+00> : vector<1x16x8xf32>
    %53 = tpu.matmul %52, %37, %cst_21 {dimension_numbers = #tpu.dot_dimension_numbers<[2], [1], [1], [2], [0, 0, 0, 1, 1, 2], [0], [0]>} : vector<1x16x16xf32>, vector<1x16x8xf32>, vector<1x16x8xf32> -> vector<1x16x8xf32>
    "tpu.trace_stop"() : () -> ()
    %54 = vector.shape_cast %53 : vector<1x16x8xf32> to vector<16x8xf32>
    %c8 = arith.constant 8 : index
    %c0_22 = arith.constant 0 : index
    %55 = vector.load %arg5[%c8, %c0_22] : memref<32x32xf32, #tpu.memory_space<vmem>>, vector<8x32xf32>
    %cst_23 = arith.constant dense<0.000000e+00> : vector<16x32xf32>
    %56 = tpu.matmul %54, %55, %cst_23 {dimension_numbers = #tpu.dot_dimension_numbers<[1], [0], [0], [1], [0, 0, 1, 1], [], []>} : vector<16x8xf32>, vector<8x32xf32>, vector<16x32xf32> -> vector<16x32xf32>
    %57 = arith.addf %31, %56 : vector<16x32xf32>
    %58 = vector.extract_strided_slice %6 {offsets = [0, 16], sizes = [16, 8], strides = [1, 1]} : vector<16x96xf32> to vector<16x8xf32>
    %59 = vector.shape_cast %58 : vector<16x8xf32> to vector<1x16x8xf32>
    %60 = vector.extract_strided_slice %6 {offsets = [0, 48], sizes = [16, 8], strides = [1, 1]} : vector<16x96xf32> to vector<16x8xf32>
    %61 = vector.shape_cast %60 : vector<16x8xf32> to vector<1x16x8xf32>
    %62 = vector.extract_strided_slice %6 {offsets = [0, 80], sizes = [16, 8], strides = [1, 1]} : vector<16x96xf32> to vector<16x8xf32>
    %63 = vector.shape_cast %62 : vector<16x8xf32> to vector<1x16x8xf32>
    "tpu.trace_start"() <{level = 10 : i32, message = "bqd,bkd->bqk"}> : () -> ()
    %cst_24 = arith.constant dense<0.000000e+00> : vector<1x16x16xf32>
    %64 = tpu.matmul %59, %61, %cst_24 {dimension_numbers = #tpu.dot_dimension_numbers<[2], [2], [1], [1], [0, 0, 0, 1, 1, 1], [0], [0]>} : vector<1x16x8xf32>, vector<1x16x8xf32>, vector<1x16x16xf32> -> vector<1x16x16xf32>
    "tpu.trace_stop"() : () -> ()
    %c2 = arith.constant 2 : index
    %c0_25 = arith.constant 0 : index
    %c0_26 = arith.constant 0 : index
    %65 = vector.load %arg4[%c2, %c0_25, %c0_26] : memref<4x16x16xf32, #tpu.memory_space<vmem>>, vector<1x16x16xf32>
    %66 = vector.shape_cast %65 : vector<1x16x16xf32> to vector<16x16xf32>
    %67 = vector.shape_cast %66 : vector<16x16xf32> to vector<1x16x16xf32>
    %68 = arith.addf %64, %67 : vector<1x16x16xf32>
    %cst_27 = arith.constant dense<0xFF800000> : vector<1x16xf32>
    %69 = vector.multi_reduction <maximumf>, %68, %cst_27 [2] : vector<1x16x16xf32> to vector<1x16xf32>
    %70 = vector.shape_cast %69 : vector<1x16xf32> to vector<1x16x1xf32>
    %71 = vector.broadcast %70 : vector<1x16x1xf32> to vector<1x16x16xf32>
    %72 = arith.subf %68, %71 : vector<1x16x16xf32>
    %73 = math.exp %72 : vector<1x16x16xf32>
    %cst_28 = arith.constant dense<0.000000e+00> : vector<1x16xf32>
    %74 = vector.multi_reduction <add>, %73, %cst_28 [2] : vector<1x16x16xf32> to vector<1x16xf32>
    %75 = vector.shape_cast %74 : vector<1x16xf32> to vector<1x16x1xf32>
    %76 = tpu.reciprocal %75 {approx = true} : vector<1x16x1xf32> -> vector<1x16x1xf32>
    %77 = vector.broadcast %76 : vector<1x16x1xf32> to vector<1x16x16xf32>
    %78 = arith.mulf %73, %77 : vector<1x16x16xf32>
    "tpu.trace_start"() <{level = 10 : i32, message = "bqk,bkd->bqd"}> : () -> ()
    %cst_29 = arith.constant dense<0.000000e+00> : vector<1x16x8xf32>
    %79 = tpu.matmul %78, %63, %cst_29 {dimension_numbers = #tpu.dot_dimension_numbers<[2], [1], [1], [2], [0, 0, 0, 1, 1, 2], [0], [0]>} : vector<1x16x16xf32>, vector<1x16x8xf32>, vector<1x16x8xf32> -> vector<1x16x8xf32>
    "tpu.trace_stop"() : () -> ()
    %80 = vector.shape_cast %79 : vector<1x16x8xf32> to vector<16x8xf32>
    %c16 = arith.constant 16 : index
    %c0_30 = arith.constant 0 : index
    %81 = vector.load %arg5[%c16, %c0_30] : memref<32x32xf32, #tpu.memory_space<vmem>>, vector<8x32xf32>
    %cst_31 = arith.constant dense<0.000000e+00> : vector<16x32xf32>
    %82 = tpu.matmul %80, %81, %cst_31 {dimension_numbers = #tpu.dot_dimension_numbers<[1], [0], [0], [1], [0, 0, 1, 1], [], []>} : vector<16x8xf32>, vector<8x32xf32>, vector<16x32xf32> -> vector<16x32xf32>
    %83 = arith.addf %57, %82 : vector<16x32xf32>
    %84 = vector.extract_strided_slice %6 {offsets = [0, 24], sizes = [16, 8], strides = [1, 1]} : vector<16x96xf32> to vector<16x8xf32>
    %85 = vector.shape_cast %84 : vector<16x8xf32> to vector<1x16x8xf32>
    %86 = vector.extract_strided_slice %6 {offsets = [0, 56], sizes = [16, 8], strides = [1, 1]} : vector<16x96xf32> to vector<16x8xf32>
    %87 = vector.shape_cast %86 : vector<16x8xf32> to vector<1x16x8xf32>
    %88 = vector.extract_strided_slice %6 {offsets = [0, 88], sizes = [16, 8], strides = [1, 1]} : vector<16x96xf32> to vector<16x8xf32>
    %89 = vector.shape_cast %88 : vector<16x8xf32> to vector<1x16x8xf32>
    "tpu.trace_start"() <{level = 10 : i32, message = "bqd,bkd->bqk"}> : () -> ()
    %cst_32 = arith.constant dense<0.000000e+00> : vector<1x16x16xf32>
    %90 = tpu.matmul %85, %87, %cst_32 {dimension_numbers = #tpu.dot_dimension_numbers<[2], [2], [1], [1], [0, 0, 0, 1, 1, 1], [0], [0]>} : vector<1x16x8xf32>, vector<1x16x8xf32>, vector<1x16x16xf32> -> vector<1x16x16xf32>
    "tpu.trace_stop"() : () -> ()
    %c3 = arith.constant 3 : index
    %c0_33 = arith.constant 0 : index
    %c0_34 = arith.constant 0 : index
    %91 = vector.load %arg4[%c3, %c0_33, %c0_34] : memref<4x16x16xf32, #tpu.memory_space<vmem>>, vector<1x16x16xf32>
    %92 = vector.shape_cast %91 : vector<1x16x16xf32> to vector<16x16xf32>
    %93 = vector.shape_cast %92 : vector<16x16xf32> to vector<1x16x16xf32>
    %94 = arith.addf %90, %93 : vector<1x16x16xf32>
    %cst_35 = arith.constant dense<0xFF800000> : vector<1x16xf32>
    %95 = vector.multi_reduction <maximumf>, %94, %cst_35 [2] : vector<1x16x16xf32> to vector<1x16xf32>
    %96 = vector.shape_cast %95 : vector<1x16xf32> to vector<1x16x1xf32>
    %97 = vector.broadcast %96 : vector<1x16x1xf32> to vector<1x16x16xf32>
    %98 = arith.subf %94, %97 : vector<1x16x16xf32>
    %99 = math.exp %98 : vector<1x16x16xf32>
    %cst_36 = arith.constant dense<0.000000e+00> : vector<1x16xf32>
    %100 = vector.multi_reduction <add>, %99, %cst_36 [2] : vector<1x16x16xf32> to vector<1x16xf32>
    %101 = vector.shape_cast %100 : vector<1x16xf32> to vector<1x16x1xf32>
    %102 = tpu.reciprocal %101 {approx = true} : vector<1x16x1xf32> -> vector<1x16x1xf32>
    %103 = vector.broadcast %102 : vector<1x16x1xf32> to vector<1x16x16xf32>
    %104 = arith.mulf %99, %103 : vector<1x16x16xf32>
    "tpu.trace_start"() <{level = 10 : i32, message = "bqk,bkd->bqd"}> : () -> ()
    %cst_37 = arith.constant dense<0.000000e+00> : vector<1x16x8xf32>
    %105 = tpu.matmul %104, %89, %cst_37 {dimension_numbers = #tpu.dot_dimension_numbers<[2], [1], [1], [2], [0, 0, 0, 1, 1, 2], [0], [0]>} : vector<1x16x16xf32>, vector<1x16x8xf32>, vector<1x16x8xf32> -> vector<1x16x8xf32>
    "tpu.trace_stop"() : () -> ()
    %106 = vector.shape_cast %105 : vector<1x16x8xf32> to vector<16x8xf32>
    %c24 = arith.constant 24 : index
    %c0_38 = arith.constant 0 : index
    %107 = vector.load %arg5[%c24, %c0_38] : memref<32x32xf32, #tpu.memory_space<vmem>>, vector<8x32xf32>
    %cst_39 = arith.constant dense<0.000000e+00> : vector<16x32xf32>
    %108 = tpu.matmul %106, %107, %cst_39 {dimension_numbers = #tpu.dot_dimension_numbers<[1], [0], [0], [1], [0, 0, 1, 1], [], []>} : vector<16x8xf32>, vector<8x32xf32>, vector<16x32xf32> -> vector<16x32xf32>
    %109 = arith.addf %83, %108 : vector<16x32xf32>
    %c0_40 = arith.constant 0 : index
    %c0_41 = arith.constant 0 : index
    %110 = vector.load %arg6[%c0_40, %c0_41] : memref<1x32xf32, #tpu.memory_space<vmem>>, vector<1x32xf32>
    %111 = vector.broadcast %110 : vector<1x32xf32> to vector<16x32xf32>
    %112 = arith.addf %109, %111 : vector<16x32xf32>
    %113 = vector.shape_cast %112 : vector<16x32xf32> to vector<1x16x32xf32>
    %c0_42 = arith.constant 0 : index
    %c0_43 = arith.constant 0 : index
    %c0_44 = arith.constant 0 : index
    %114 = vector.load %arg7[%c0_42, %c0_43, %c0_44] : memref<1x16x32xf32, #tpu.memory_space<vmem>>, vector<1x16x32xf32>
    tpu.vector_store %arg7[%c0_42, %c0_43, %c0_44], %113 {strides = array<i32>} : memref<1x16x32xf32, #tpu.memory_space<vmem>>, vector<1x16x32xf32>,
    return
  }
  func.func @transform_0(%arg0: i32) -> (i32, i32, i32) {
    %c0_i32 = arith.constant 0 : i32
    %c0_i32_0 = arith.constant 0 : i32
    %c0_i32_1 = arith.constant 0 : i32
    return %arg0, %c0_i32, %c0_i32_0 : i32, i32, i32
  }
  func.func @transform_1(%arg0: i32) -> (i32, i32) {
    %c0_i32 = arith.constant 0 : i32
    %c0_i32_0 = arith.constant 0 : i32
    %c0_i32_1 = arith.constant 0 : i32
    return %c0_i32, %c0_i32_0 : i32, i32
  }
  func.func @transform_2(%arg0: i32) -> (i32, i32) {
    %c0_i32 = arith.constant 0 : i32
    %c0_i32_0 = arith.constant 0 : i32
    %c0_i32_1 = arith.constant 0 : i32
    return %c0_i32, %c0_i32_0 : i32, i32
  }
  func.func @transform_3(%arg0: i32) -> (i32, i32, i32) {
    %c0_i32 = arith.constant 0 : i32
    %c0_i32_0 = arith.constant 0 : i32
    %c0_i32_1 = arith.constant 0 : i32
    %c0_i32_2 = arith.constant 0 : i32
    return %c0_i32, %c0_i32_0, %c0_i32_1 : i32, i32, i32
  }
  func.func @transform_4(%arg0: i32) -> (i32, i32) {
    %c0_i32 = arith.constant 0 : i32
    %c0_i32_0 = arith.constant 0 : i32
    %c0_i32_1 = arith.constant 0 : i32
    return %c0_i32, %c0_i32_0 : i32, i32
  }
  func.func @transform_5(%arg0: i32) -> (i32, i32) {
    %c0_i32 = arith.constant 0 : i32
    %c0_i32_0 = arith.constant 0 : i32
    %c0_i32_1 = arith.constant 0 : i32
    return %c0_i32, %c0_i32_0 : i32, i32
  }
  func.func @transform_6(%arg0: i32) -> (i32, i32, i32) {
    %c0_i32 = arith.constant 0 : i32
    %c0_i32_0 = arith.constant 0 : i32
    %c0_i32_1 = arith.constant 0 : i32
    return %arg0, %c0_i32, %c0_i32_0 : i32, i32, i32
  }
}

</mosaic_0001>

<bundles_post_ra>
// kernel: tpu_custom_call.1
= control target key start
LH: loop header
LB: loop body
LE: loop exit
PB: predicated region body
PF: predicated region fallthrough
CT: control target
= control target key end

     0   :  { %11 = vsyncpa [#allocation3], 0  ;;  %s2714_s0 = inlined_call_operand.hbm [shape: f32[2,16,32], index: 0, kind: input, shape index: {}]   ;;  %s2715_s1 = inlined_call_operand.hbm [shape: f32[32,96], index: 1, kind: input, shape index: {}]   ;;  %s2716_s2 = inlined_call_operand.vmem [shape: f32[1,96], index: 2, kind: input, shape index: {}]   ;;  %s2717_s3 = inlined_call_operand.hbm [shape: f32[4,16,16], index: 3, kind: input, shape index: {}]   ;;  %s2718_s4 = inlined_call_operand.hbm [shape: f32[32,32], index: 4, kind: input, shape index: {}]   ;;  %s2719_s5 = inlined_call_operand.vmem [shape: f32[1,32], index: 5, kind: input, shape index: {}]   ;;  %s2720_s6 = inlined_call_operand.hbm [shape: f32[2,16,32], index: 6, kind: output, shape index: {}]  }
   0x1   :  { %13 = vsyncpa [#allocation3 + $0x1], 0 }
   0x2   :  { %14 = vsyncpa [#allocation6], 0 }
   0x3   :  { %15 = vsyncpa [#allocation9], 0 }
   0x4   :  { %16 = vsyncpa [#allocation4], 0 }
   0x5   :  { %18 = vsyncpa [#allocation4 + $0x1], 0  ;;  %s2337_s21 = smov 0   ;;  %s2339_s22 = smov 0  }
   0x6   :  { %s2341_s23 = smov 0   ;;  %s2343_s24 = smov 0  }
   0x7 LB: > { %s2358_s25 = sadd.s32 4294967295, %s2280_s24   ;;  %s1679_s26 = sadd.s32 4294967294, %s2280_s24   ;;  %s2280_s24 = sphi %s2343_s24, %s2745_s24   ;;  %s2276_s23 = sphi %s2341_s23, %s2744_s23   ;;  %s2272_s22 = sphi %s2339_s22, %s2743_s22   ;;  %s2268_s21 = sphi %s2337_s21, %s2742_s21  }
   0x8   : > { %p44_p0 = scmp.ne.s32.totalorder %s2272_s22, %s2268_s21  ;;  %p2721_p1 = scmp.eq.s32.totalorder %s2358_s25, 0 }
   0x9   : > { %p179_p3 = scmp.eq.s32.totalorder %s1679_s26, 1  ;;  %p1680_p5 = scmp.ge.s32.totalorder %s2280_s24, 1 }
   0xa   : > { %p2367_p4 = por %p2721_p1, %p44_p0  ;;  %p186_p7 = scmp.lt.s32.totalorder %s2280_s24, 3 }
   0xb   : > { %p2372_p6 = por %p179_p3, %p44_p0  ;;  %s2282_s30 = smov [#allocation5]  }
   0xc   : > { %s2724_s27 = scalar_select %p2367_p4, 1, 0 }
   0xd   : > { %s2725_s28 = scalar_select %p2372_p6, 1, 0 }
   0xe   : > { %p2377_p8 = pnand %p1680_p5, %p186_p7  ;;  %s198_s7 = sshll.u32 %s2282_s30, 4  ;;  %s2381_s7 = int_to_ptr.vmem [resolvable:$true] %s198_s7 }
   0xf   : > { %s2283_s9 = smov [#allocation7]   ;;  %s2284_s11 = smov [#allocation8]  }
  0x10   : > { %s2726_s29 = scalar_select %p2377_p8, 1, 0 }
  0x11   : > { %p1944_p9 = pneg %p2377_p8  ;;  %s214_s10 = sshll.u32 %s2283_s9, 4  ;;  %s2392_s10 = int_to_ptr.vmem [resolvable:$true] %s214_s10 }
  0x12   : > { %s2394_s12 = sshll.u32 %s2284_s11, 4  ;;  %s2092_s15 = scalar_lea.hbm %s2715_s1, 512  ;;  %s228_s12 = int_to_ptr.vmem [resolvable:$true] %s2394_s12 }
  0x13   : > { %p2388_p11 = pnand %p1944_p9, %p2721_p1  ;;  %p2093_p12 = scmp.ne.s32.totalorder %s2715_s1, %s2092_s15 }
  0x14   : > { %p2099_p5 = scmp.lt.u32.totalorder %s2092_s15, %s2715_s1 }
  0x15   : > { %p2404_p13 = pneg %p2388_p11 }
  0x17   : > { %p2095_p0 = pnand %p2404_p13, %p2093_p12 }
  0x19   : > { %p2096_p3 = pneg %p2095_p0 }
  0x1b   : > { %p2101_p7 = pnand %p2099_p5, %p2096_p3 }
  0x1d   : > { %2104 = shalt.err (!%p2101_p7)
}
  0x1e   : > { %s2105_s26 = scalar_lea.vmem %s2381_s7, 512  ;;  %p2113_p2 = scmp.lt.s32.totalorder %s2381_s7, %s2381_s7 }
  0x1f   : > { %p2106_p9 = scmp.ne.s32.totalorder %s2381_s7, %s2105_s26  ;;  %p2114_p6 = scmp.lt.s32.totalorder %s2105_s26, %s2105_s26 }
  0x21   : > { %p2108_p10 = pnand %p2106_p9, %p2404_p13  ;;  %p2115_p12 = por %p2114_p6, %p2113_p2 }
  0x23   : > { %p2109_p1 = pneg %p2108_p10 }
  0x25   : > { %p2116_p0 = pnand %p2115_p12, %p2109_p1 }
  0x27   : > { %2119 = shalt.err (!%p2116_p0)
}
  0x28   : > { %s2285_s30 = smov 128   ;;  %s2286_s9 = smov 8  }
  0x29   : > { %1947 = dma.hbm_to_vmem [thread:$0]  (!%p2388_p11), %s2715_s1, 512, %s2381_s7, [#allocation6], %s2285_s30, %s2285_s30, %s2286_s9  }
  0x2a   : > { %s2120_s16 = scalar_lea.hbm %s2717_s3, 1024 }
  0x2b   : > { %p2121_p1 = scmp.ne.s32.totalorder %s2717_s3, %s2120_s16  ;;  %p2127_p10 = scmp.lt.u32.totalorder %s2120_s16, %s2717_s3 }
  0x2d   : > { %p2123_p2 = pnand %p2121_p1, %p2404_p13 }
  0x2f   : > { %p2124_p6 = pneg %p2123_p2 }
  0x31   : > { %p2129_p3 = pnand %p2127_p10, %p2124_p6 }
  0x33   : > { %2132 = shalt.err (!%p2129_p3)
}
  0x34   : > { %s2133_s7 = scalar_lea.vmem %s2392_s10, 1024  ;;  %p2141_p12 = scmp.lt.s32.totalorder %s2392_s10, %s2392_s10 }
  0x35   : > { %p2134_p5 = scmp.ne.s32.totalorder %s2392_s10, %s2133_s7  ;;  %p2142_p0 = scmp.lt.s32.totalorder %s2133_s7, %s2133_s7 }
  0x37   : > { %p2136_p7 = pnand %p2134_p5, %p2404_p13  ;;  %p2143_p1 = por %p2142_p0, %p2141_p12 }
  0x39   : > { %p2137_p9 = pneg %p2136_p7 }
  0x3b   : > { %p2144_p2 = pnand %p2143_p1, %p2137_p9 }
  0x3d   : > { %2147 = shalt.err (!%p2144_p2)
}
  0x3e   : > { %1950 = dma.hbm_to_vmem [thread:$0]  (!%p2388_p11), %s2717_s3, 1024, %s2392_s10, [#allocation6], %s2285_s30, %s2285_s30, %s2286_s9  }
  0x3f   : > { %s2148_s16 = scalar_lea.hbm %s2718_s4, 512 }
  0x40   : > { %p2149_p6 = scmp.ne.s32.totalorder %s2718_s4, %s2148_s16  ;;  %p2155_p5 = scmp.lt.u32.totalorder %s2148_s16, %s2718_s4 }
  0x42   : > { %p2151_p10 = pnand %p2149_p6, %p2404_p13 }
  0x44   : > { %p2152_p3 = pneg %p2151_p10 }
  0x46   : > { %p2157_p7 = pnand %p2155_p5, %p2152_p3 }
  0x48   : > { %2160 = shalt.err (!%p2157_p7)
}
  0x49   : > { %s2161_s7 = scalar_lea.vmem %s228_s12, 512  ;;  %p2169_p1 = scmp.lt.s32.totalorder %s228_s12, %s228_s12 }
  0x4a   : > { %p2162_p9 = scmp.ne.s32.totalorder %s228_s12, %s2161_s7  ;;  %p2170_p2 = scmp.lt.s32.totalorder %s2161_s7, %s2161_s7 }
  0x4c   : > { %p2164_p12 = pnand %p2162_p9, %p2404_p13  ;;  %p2171_p4 = por %p2170_p2, %p2169_p1 }
  0x4e   : > { %p2165_p0 = pneg %p2164_p12 }
  0x50   : > { %p2172_p8 = pnand %p2171_p4, %p2165_p0 }
  0x52   : > { %2175 = shalt.err (!%p2172_p8)
}
  0x53   : > { %1953 = dma.hbm_to_vmem [thread:$0]  (!%p2388_p11), %s2718_s4, 512, %s228_s12, [#allocation9], %s2285_s30, %s2285_s30, %s2286_s9  }
  0x54   : > { %s2477_s18 = sadd.s32 1, %s2280_s24   ;;  %s31_s13 = sadd.s32 1, %s2276_s23 }
  0x55   : > { %s28_s8 = ssub.s32 %s2280_s24, %s2477_s18  ;;  %p38_p8 = scmp.ne.s32.totalorder %s2276_s23, %s2272_s22 }
  0x56   : > { %p29_p4 = scmp.eq.s32.totalorder %s28_s8, 0  ;;  %p39_p13 = scmp.eq.s32.totalorder %s2280_s24, 0 }
  0x57   : > { %p1965_p6 = scmp.lt.s32.totalorder %s2280_s24, 2  ;;  %p2729_p3 = scmp.eq.s32.totalorder %s2358_s25, 1 }
  0x58   : > { %s2487_s14 = scalar_select %p29_p4, %s2276_s23, %s31_s13  }
  0x59   : > { %p40_p10 = por %p39_p13, %p38_p8  ;;  %p2491_p5 = por %p2729_p3, %p38_p8 }
  0x5a   : > { %s244_s16 = sand.u32 1, %s2276_s23   ;;  %s1735_s17 = sshll.u32 %s2280_s24, 8 }
  0x5b   : > { %s1685_s12 = sshll.u32 %s244_s16, 4  ;;  %s2500_s26 = scalar_lea.hbm %s2714_s0, %s1735_s17 }
  0x5c   : > { %s248_s7 = scalar_lea.vmem [#allocation2], %s1685_s12  ;;  %p2502_p11 = pnand %p1965_p6, %p40_p10 }
  0x5d   : > { %s255_s10 = sshll.u32 %s248_s7, 4  ;;  %s2508_s8 = scalar_lea.sflag [#allocation3], %s244_s16  ;;  %s2506_s10 = int_to_ptr.vmem [resolvable:$true] %s255_s10 }
  0x5e   : > { %s2176_s13 = scalar_lea.hbm %s2500_s26, 256  ;;  %p2178_p9 = pneg %p2502_p11 }
  0x5f   : > { %p2177_p7 = scmp.ne.s32.totalorder %s2500_s26, %s2176_s13  ;;  %s2181_s19 = scalar_lea.hbm %s2714_s0, 512 }
  0x60   : > { %p2182_p1 = scmp.lt.u32.totalorder %s2500_s26, %s2714_s0  ;;  %p2183_p2 = scmp.lt.u32.totalorder %s2181_s19, %s2176_s13 }
  0x61   : > { %p2179_p12 = pnand %p2178_p9, %p2177_p7  ;;  %p2185_p8 = scmp.lt.u32.totalorder %s2176_s13, %s2500_s26 }
  0x62   : > { %p2184_p4 = por %p2183_p2, %p2182_p1 }
  0x63   : > { %p2180_p0 = pneg %p2179_p12 }
  0x64   : > { %p2186_p13 = por %p2185_p8, %p2184_p4 }
  0x66   : > { %p2187_p6 = pnand %p2186_p13, %p2180_p0 }
  0x68   : > { %2190 = shalt.err (!%p2187_p6)
}
  0x69   : > { %s2191_s16 = scalar_lea.vmem %s2506_s10, 256  ;;  %s2287_s17 = smov [#allocation2]  }
  0x6a   : > { %p2192_p10 = scmp.ne.s32.totalorder %s2506_s10, %s2191_s16  ;;  %s2196_s12 = sshll.u32 %s2287_s17, 4  ;;  %s2197_s12 = int_to_ptr.vmem [resolvable:$false] %s2196_s12 }
  0x6b   : > { %s2198_s20 = scalar_lea.vmem %s2197_s12, 512  ;;  %p2199_p12 = scmp.lt.s32.totalorder %s2506_s10, %s2197_s12 }
  0x6c   : > { %p2194_p3 = pnand %p2192_p10, %p2178_p9  ;;  %p2200_p1 = scmp.lt.s32.totalorder %s2198_s20, %s2191_s16 }
  0x6e   : > { %p2195_p7 = pneg %p2194_p3  ;;  %p2201_p2 = por %p2200_p1, %p2199_p12 }
  0x70   : > { %p2202_p4 = pnand %p2201_p2, %p2195_p7 }
  0x72   : > { %2205 = shalt.err (!%p2202_p4)
}
  0x73   : > { %1957 = dma.hbm_to_vmem [thread:$0]  (!%p2502_p11), %s2500_s26, 256, %s2506_s10, %s2508_s8, %s2285_s30, %s2285_s30, %s2286_s9  }
  0x74   : > { %p2732_p9 = scmp.ne.s32.totalorder %s2726_s29, 0 }
  0x75   : > { %s2542_s13 = sand.u32 (!%p2732_p9), 1, %s2272_s22   ;;  %p2733_p0 = scmp.ne.s32.totalorder (!%p2732_p9), %s2724_s27, 0 }
  0x76   : > { %267 = sbr.rel (%p2732_p9) target bundleno = 2537 (0x9e9), region = 44  ;;  %s1689_s19 = sshll.u32 (!%p2732_p9), %s2542_s13, 4 }
  0x77   : > { %s270_s7 = scalar_lea.sflag (!%p2732_p9), [#allocation3], %s2542_s13  ;;  %s273_s11 = scalar_lea.vmem (!%p2732_p9), [#allocation2], %s1689_s19 }
  0x7d   : > { %2251 = dma.done.wait (%p2733_p0), %s270_s7, 256  }
  0x7e   : > { %2253 = vsyncadd (%p2733_p0), %s270_s7, 4294967040  ;;  %p2734_p11 = scmp.eq.s32.totalorder %s2358_s25, 0 }
  0x80   : > { %2255 = dma.done.wait (%p2734_p11), [#allocation6], 1536   ;;  %p2735_p8 = pmov %p2734_p11 }
  0x82   : > { %2257 = vsyncadd (%p2735_p8), [#allocation6], 4294965760  ;;  %p2736_p13 = pmov %p2735_p8 }
  0x83   : > { %p2737_p6 = pmov %p2735_p8 }
  0x84   : > { %2259 = dma.done.wait (%p2736_p13), [#allocation9], 512  }
  0x85   : > { %2261 = vsyncadd (%p2737_p6), [#allocation9], 4294966784  ;;  %vm327_vm0 = vcmask 261120   ;;  %v316_v0 = vld [vmem:[#allocation5] sm:$0xff]  ;;  %v317_v1 = vld [vmem:[#allocation5 + $0x8] sm:$0xff]  ;;  %vm417_vm1 = vcmask 64512  }
  0x86   : > { %v318_v2 = vld [vmem:[#allocation5 + $0x10] sm:$0xff]  ;;  %v1874_v3 = vpack.c.bf16 %v317_v1, %v316_v0  ;;  %v319_v4 = vld [vmem:[#allocation5 + $0x18] sm:$0xff]  ;;  %v1694_v8 = vld [vmem:[%s2716_s2] ss:$0 sm:$0xff]  ;;  %s2288_s30 = smov 96   ;;  %vm501_vm3 = vcmask 130048  }
  0x87   : > { %v314_v5 = vld [vmem:[%s273_s11] sm:$0xff]  ;;  %v1878_v6 = vpack.c.bf16 %v319_v4, %v318_v2  ;;  %v315_v7 = vld [vmem:[%s273_s11 + $0x8] sm:$0xff]  ;;  %vm2578_vm2 = vmpackc.low %vm417_vm1, %vm417_vm1  ;;  %s2289_s9 = smov 64   ;;  %s2290_s26 = smov 88  }
  0x88   : > { %1795 = vmatprep.mubr.msk.f32.mxu0 %vm327_vm0, %v314_v5  ;;  %1875 = vmatprep.subr.bf16.mxu0 %v1874_v3  ;;  %v410_v19 = vld [vmem:[#allocation7 + $0x8] sm:$0xff]  ;;  %v409_v20 = vld [vmem:[#allocation7] sm:$0xff]  ;;  %s2291_s10 = smov 120   ;;  %s2292_s8 = smov 80   ;;  %v614_v61 = vld [vmem:[#allocation7 + $0x18] sm:$0xff] }
  0x89   : > { %1877 = vmatpush3.bf16.msra.mxu0 %v1874_v3  ;;  %s2293_s16 = smov 112   ;;  %v613_v62 = vld [vmem:[#allocation7 + $0x10] sm:$0xff]  ;;  %s2294_s17 = smov 56  }
  0x8a   : > { %1879 = vmatprep.subr.bf16.mxu0 %v1878_v6  ;;  %s2295_s12 = smov 72   ;;  %s2296_s20 = smov 104  }
  0x8b   : > { %s2297_s7 = smov 48   ;;  %s2298_s11 = smov 40  }
  0x8c   : > { %s313_s27 = scalar_lea.vmem [#allocation10], %s1689_s19  ;;  %s1564_s19 = scalar_lea.sflag [#allocation4], %s2542_s13 }
  0x8d   : > { %1881 = vmatpush3.bf16.msra.mxu0 %v1878_v6  ;;  %s1577_s29 = sshll.u32 %s313_s27, 4  ;;  %s2663_s29 = int_to_ptr.vmem [resolvable:$true] %s1577_s29 }
  0x90   : > { %1796 = vmatmul.mubr.msk.f32.vlgmr.msra.gmra.mrb[0].mxu0 %vm327_vm0, %v315_v7 }
 0x163   : > { %v1797_v9 = vpop.f32.mrb[0].mxu0 }
 0x164   : > { %v2565_v10 = vadd.f32 %v1797_v9, %v1694_v8  ;;  %v400_v11 = vpop.f32.mrb[1].mxu0 }
 0x165   : > { %v2567_v12 = vadd.f32 %v1694_v8, %v400_v11 }
 0x167   : > { %1802 = vmatprep.mubr.msk.f32.mxu1 %vm417_vm1, %v2567_v12  ;;  %v2573_v13 = vpack.i.bf16 %v2565_v10, %v2567_v12 }
 0x169   : > { %2021 = vrot.lane.b32.xlu0 %v2573_v13, %s2288_s30 }
 0x1db   : > { %v2022_v14 = vpop.permute.xlu0 %2021 }
 0x1dc   : > { %v2024_v15 = vunpack.i.h.bf16 %v2022_v14  ;;  %v2023_v16 = vunpack.i.l.bf16 %v2022_v14 }
 0x1de   : > { %v1882_v18 = vpack.c.bf16 %v2024_v15, %v2023_v16 }
 0x1e0   : > { %1884 = vmatprep.subr.msk.bf16.mxu1 %vm2578_vm2, %v1882_v18 }
 0x1e1   : > { %1887 = vmatpush3.bf16.xpose.msk.msra.mxu1 %vm2578_vm2, %v1882_v18 }
 0x1e8   : > { %1803 = vmatmul.mubr.msk.f32.vlgmr.msra.gmra.mrb[0].mxu1 %vm417_vm1, %v2565_v10 }
 0x2bb   : > { %v1804_v21 = vpop.f32.mrb[0].mxu1 }
 0x2bc   : > { %v498_v22 = vadd.f32 %v1804_v21, %v410_v19  ;;  %v492_v23 = vpop.f32.mrb[1].mxu1  ;;  %v979_v21 = vld [vmem:[#allocation7 + $0x20] sm:$0xff] }
 0x2bd   : > { %v493_v24 = vadd.f32 %v492_v23, %v409_v20 }
 0x2be   : > { %v505_v25 = vsel %vm501_vm3, %v498_v22, -inf }
 0x2bf   : > { %506 = vmax.xlane.f32.xlu1 %v505_v25  ;;  %v502_v26 = vsel %vm501_vm3, %v493_v24, -inf }
 0x2c0   : > { %503 = vmax.xlane.f32.xlu0 %v502_v26 }
 0x2d0   : > { %2026 = vrot.lane.b32.xlu1 %v2573_v13, %s2289_s9 }
 0x2d4   : > { %2031 = vrot.lane.b32.xlu1 %v2573_v13, %s2290_s26  ;;  %s1736_s26 = sshll.u32 %s2358_s25, 8  ;;  %s2206_s25 = scalar_lea.vmem %s2663_s29, 256 }
 0x2d5   : > { %p2207_p10 = scmp.ne.s32.totalorder %s2663_s29, %s2206_s25 }
 0x2d6   : > { %617 = vrot.lane.b32.xlu0 %v2565_v10, %s2291_s10 }
 0x2d7   : > { %p2208_p3 = pnand %p2207_p10, %p2491_p5 }
 0x2d9   : > { %p2209_p7 = pneg %p2208_p3 }
 0x34c   : > { %v507_v27 = vpop.xlane.xlu1 %506 }
 0x34d   : > { %v509_v28 = vsub.f32 %v498_v22, %v507_v27  ;;  %v504_v29 = vpop.xlane.xlu0 %503 }
 0x34e   : > { %v508_v30 = vsub.f32 %v493_v24, %v504_v29  ;;  %v980_v24 = vld [vmem:[#allocation7 + $0x28] sm:$0xff] }
 0x34f   : > { %v512_v31 = vmul.f32 1.442695, %v509_v28 }
 0x350   : > { %v510_v32 = vmul.f32 1.442695, %v508_v30  ;;  %v2027_v33 = vpop.permute.xlu1 %2026 }
 0x351   : > { %2060 = vpow2.f32 %v512_v31  ;;  %v2029_v34 = vunpack.i.h.bf16 %v2027_v33  ;;  %v2028_v35 = vunpack.i.l.bf16 %v2027_v33  ;;  %v618_v56 = vpop.permute.xlu0 %617 }
 0x352   : > { %2062 = vpow2.f32 %v510_v32 }
 0x353   : > { %v1888_v36 = vpack.c.bf16 %v2029_v34, %v2028_v35 }
 0x354   : > { %v2032_v37 = vpop.permute.xlu1 %2031 }
 0x355   : > { %v2034_v38 = vunpack.i.h.bf16 %v2032_v37  ;;  %v2033_v39 = vunpack.i.l.bf16 %v2032_v37  ;;  %1889 = vmatprep.subr.bf16.mxu1 %v1888_v36 }
 0x356   : > { %1891 = vmatpush3.bf16.msra.mxu1 %v1888_v36 }
 0x357   : > { %v1892_v40 = vpack.c.bf16 %v2034_v38, %v2033_v39 }
 0x359   : > { %1894 = vmatprep.subr.msk.bf16.mxu1 %vm2578_vm2, %v1892_v40 }
 0x35b   : > { %v2061_v41 = vpop.eup %2060 }
 0x35c   : > { %v517_v42 = vsel %vm501_vm3, %v2061_v41, 0.0  ;;  %v2063_v43 = vpop.eup %2062 }
 0x35d   : > { %518 = vadd.xlane.f32.xlu1 %v517_v42  ;;  %v514_v44 = vsel %vm501_vm3, %v2063_v43, 0.0 }
 0x361   : > { %515 = vadd.xlane.f32.xlu1 %v514_v44 }
 0x372   : > { %615 = vrot.lane.b32.xlu1 %v2567_v12, %s2291_s10 }
 0x376   : > { %2036 = vrot.lane.b32.xlu1 %v2573_v13, %s2292_s8 }
 0x37a   : > { %981 = vrot.lane.b32.xlu1 %v2567_v12, %s2293_s16 }
 0x37e   : > { %983 = vrot.lane.b32.xlu1 %v2565_v10, %s2293_s16  ;;  %s2668_s16 = scalar_lea.hbm %s2720_s6, %s1736_s26 }
 0x3ea   : > { %v519_v45 = vpop.xlane.xlu1 %518 }
 0x3eb   : > { %2064 = vrcp.f32 %v519_v45 }
 0x3ee   : > { %v516_v46 = vpop.xlane.xlu1 %515 }
 0x3ef   : > { %2066 = vrcp.f32 %v516_v46 }
 0x3f2   : > { %v616_v47 = vpop.permute.xlu1 %615 }
 0x3f5   : > { %v2065_v49 = vpop.eup %2064 }
 0x3f6   : > { %v2037_v48 = vpop.permute.xlu1 %2036  ;;  %v523_v54 = vmul.f32 %v2065_v49, %v2061_v41  ;;  %v815_v49 = vld [vmem:[#allocation8 + $0x8] sm:$0xff] }
 0x3f7   : > { %v2039_v51 = vunpack.i.h.bf16 %v2037_v48  ;;  %v2038_v52 = vunpack.i.l.bf16 %v2037_v48 }
 0x3f9   : > { %v2067_v50 = vpop.eup %2066  ;;  %v1902_v55 = vpack.c.bf16 %v2039_v51, %v2038_v52 }
 0x3fa   : > { %v522_v53 = vmul.f32 %v2067_v50, %v2063_v43  ;;  %v982_v57 = vpop.permute.xlu1 %981  ;;  %v611_v50 = vld [vmem:[#allocation8] sm:$0xff] }
 0x3fc   : > { %1809 = vmatprep.mubr.msk.f32.mxu1 %vm501_vm3, %v522_v53 }
 0x3fd   : > { %1810 = vmatmul.mubr.msk.f32.vlgmr.msra.gmra.mrb[2].mxu1 %vm501_vm3, %v523_v54 }
 0x3fe   : > { %1897 = vmatpush3.bf16.xpose.msk.msra.mxu1 %vm2578_vm2, %v1892_v40  ;;  %1816 = vmatprep.mubr.msk.f32.mxu1 %vm417_vm1, %v616_v47  ;;  %v984_v58 = vpop.permute.xlu1 %983 }
 0x3ff   : > { %1904 = vmatprep.subr.msk.bf16.mxu1 %vm2578_vm2, %v1902_v55 }
 0x405   : > { %1817 = vmatmul.mubr.msk.f32.vlgmr.msra.gmra.mrb[4].mxu1 %vm417_vm1, %v618_v56 }
 0x406   : > { %1907 = vmatpush3.bf16.xpose.msk.msra.mxu1 %vm2578_vm2, %v1902_v55  ;;  %1840 = vmatprep.mubr.msk.f32.mxu1 %vm417_vm1, %v982_v57  ;;  %v1266_v57 = vld [vmem:[#allocation7 + $0x30] sm:$0xff] }
 0x40d   : > { %1841 = vmatmul.mubr.msk.f32.vlgmr.msra.gmra.mrb[6].mxu1 %vm417_vm1, %v984_v58 }
 0x4d0   : > { %v2613_v59 = vpop.f32.mrb[2].mxu1 }
 0x4d1   : > { %v2615_v60 = vpop.f32.mrb[3].mxu1 }
 0x4d8   : > { %v1818_v63 = vpop.f32.mrb[4].mxu1 }
 0x4d9   : > { %v703_v0 = vadd.f32 %v1818_v63, %v614_v61  ;;  %v697_v1 = vpop.f32.mrb[5].mxu1 }
 0x4da   : > { %v698_v2 = vadd.f32 %v697_v1, %v613_v62  ;;  %v1267_v62 = vld [vmem:[#allocation7 + $0x38] sm:$0xff] }
 0x4db   : > { %v709_v3 = vsel %vm501_vm3, %v703_v0, -inf }
 0x4dc   : > { %710 = vmax.xlane.f32.xlu0 %v709_v3  ;;  %v706_v4 = vsel %vm501_vm3, %v698_v2, -inf }
 0x4dd   : > { %707 = vmax.xlane.f32.xlu1 %v706_v4 }
 0x4e0   : > { %v1842_v5 = vpop.f32.mrb[6].mxu1 }
 0x4e1   : > { %v1063_v6 = vpop.f32.mrb[7].mxu1  ;;  %v1069_v25 = vadd.f32 %v1842_v5, %v980_v24 }
 0x4e2   : > { %v1064_v22 = vadd.f32 %v1063_v6, %v979_v21 }
 0x4e3   : > { %v1075_v26 = vsel %vm501_vm3, %v1069_v25, -inf }
 0x4e4   : > { %v1072_v23 = vsel %vm501_vm3, %v1064_v22, -inf }
 0x569   : > { %v711_v7 = vpop.xlane.xlu0 %710 }
 0x56a   : > { %v713_v8 = vsub.f32 %v703_v0, %v711_v7  ;;  %v708_v9 = vpop.xlane.xlu1 %707 }
 0x56b   : > { %v712_v11 = vsub.f32 %v698_v2, %v708_v9  ;;  %v1181_v9 = vld [vmem:[#allocation8 + $0x10] sm:$0xff] }
 0x56c   : > { %v716_v14 = vmul.f32 1.442695, %v713_v8 }
 0x56d   : > { %v714_v15 = vmul.f32 1.442695, %v712_v11 }
 0x56e   : > { %2068 = vpow2.f32 %v716_v14 }
 0x56f   : > { %2070 = vpow2.f32 %v714_v15 }
 0x578   : > { %v2069_v16 = vpop.eup %2068 }
 0x579   : > { %v2071_v18 = vpop.eup %2070  ;;  %v721_v19 = vsel %vm501_vm3, %v2069_v16, 0.0 }
 0x57a   : > { %722 = vadd.xlane.f32.xlu0 %v721_v19  ;;  %v718_v20 = vsel %vm501_vm3, %v2071_v18, 0.0 }
 0x57b   : > { %719 = vadd.xlane.f32.xlu1 %v718_v20 }
 0x58c   : > { %2041 = vrot.lane.b32.xlu1 %v2573_v13, %s2294_s17  ;;  %s2299_s17 = smov [#allocation10]  }
 0x590   : > { %2046 = vrot.lane.b32.xlu0 %v2573_v13, %s2295_s12  ;;  %1268 = vrot.lane.b32.xlu1 %v2567_v12, %s2296_s20  ;;  %s2210_s12 = sshll.u32 %s2299_s17, 4  ;;  %s2211_s12 = int_to_ptr.vmem [resolvable:$false] %s2210_s12 }
 0x591   : > { %p2213_p12 = scmp.lt.s32.totalorder %s2663_s29, %s2211_s12 }
 0x594   : > { %1270 = vrot.lane.b32.xlu1 %v2565_v10, %s2296_s20  ;;  %s2212_s20 = scalar_lea.vmem %s2211_s12, 512 }
 0x595   : > { %p2214_p1 = scmp.lt.s32.totalorder %s2212_s20, %s2206_s25 }
 0x597   : > { %p2215_p2 = por %p2214_p1, %p2213_p12 }
 0x599   : > { %p2216_p4 = pnand %p2215_p2, %p2209_p7 }
 0x5af   : > { %1073 = vmax.xlane.f32.xlu0 %v1072_v23 }
 0x5b8   : > { %1076 = vmax.xlane.f32.xlu1 %v1075_v26 }
 0x5c9   : > { %2051 = vrot.lane.b32.xlu1 %v2573_v13, %s2297_s7 }
 0x5cd   : > { %2056 = vrot.lane.b32.xlu1 %v2573_v13, %s2298_s11 }
 0x607   : > { %v723_v27 = vpop.xlane.xlu0 %722 }
 0x608   : > { %2072 = vrcp.f32 %v723_v27  ;;  %v720_v12 = vpop.xlane.xlu1 %719 }
 0x609   : > { %2074 = vrcp.f32 %v720_v12  ;;  %v1468_v12 = vld [vmem:[#allocation8 + $0x18] sm:$0xff] }
 0x60b   : > { %v2047_v10 = vpop.permute.xlu0 %2046 }
 0x60c   : > { %v2049_v28 = vunpack.i.h.bf16 %v2047_v10  ;;  %v2048_v29 = vunpack.i.l.bf16 %v2047_v10  ;;  %v2042_v30 = vpop.permute.xlu1 %2041 }
 0x60d   : > { %v2044_v31 = vunpack.i.h.bf16 %v2042_v30  ;;  %v2043_v32 = vunpack.i.l.bf16 %v2042_v30 }
 0x60e   : > { %v1912_v33 = vpack.c.bf16 %v2049_v28, %v2048_v29 }
 0x60f   : > { %v1898_v34 = vpack.c.bf16 %v2044_v31, %v2043_v32 }
 0x610   : > { %1914 = vmatprep.subr.msk.bf16.mxu1 %vm2578_vm2, %v1912_v33  ;;  %v1269_v35 = vpop.permute.xlu1 %1268 }
 0x611   : > { %1899 = vmatprep.subr.bf16.mxu0 %v1898_v34  ;;  %1917 = vmatpush3.bf16.xpose.msk.msra.mxu1 %vm2578_vm2, %v1912_v33 }
 0x612   : > { %v2073_v13 = vpop.eup %2072  ;;  %1859 = vmatprep.mubr.msk.f32.mxu1 %vm417_vm1, %v1269_v35  ;;  %1901 = vmatpush3.bf16.msra.mxu0 %v1898_v34  ;;  %v1729_v35 = vld [vmem:[%s2719_s5] ss:$0 sm:$0xff] }
 0x613   : > { %v2075_v36 = vpop.eup %2074  ;;  %v727_v38 = vmul.f32 %v2073_v13, %v2069_v16  ;;  %1826 = vmatprep.subr.mxu0 %v815_v49 }
 0x614   : > { %v726_v37 = vmul.f32 %v2075_v36, %v2071_v18  ;;  %v1271_v39 = vpop.permute.xlu1 %1270 }
 0x616   : > { %1823 = vmatprep.mubr.msk.f32.mxu0 %vm501_vm3, %v726_v37 }
 0x617   : > { %1824 = vmatmul.mubr.msk.f32.vlgmr.msra.gmra.mrb[2].mxu0 %vm501_vm3, %v727_v38 }
 0x618   : > { %1860 = vmatmul.mubr.msk.f32.vlgmr.msra.gmra.mrb[8].mxu1 %vm417_vm1, %v1271_v39  ;;  %1827 = vmatpush3.msra.mxu0 %v815_v49 }
 0x619   : > { %1831 = vmatprep.subr.mxu0 %v611_v50 }
 0x63c   : > { %v1074_v40 = vpop.xlane.xlu0 %1073 }
 0x63d   : > { %v1078_v41 = vsub.f32 %v1064_v22, %v1074_v40 }
 0x63f   : > { %v1080_v42 = vmul.f32 1.442695, %v1078_v41 }
 0x641   : > { %2076 = vpow2.f32 %v1080_v42 }
 0x645   : > { %v1077_v17 = vpop.xlane.xlu1 %1076 }
 0x646   : > { %v1079_v43 = vsub.f32 %v1069_v25, %v1077_v17 }
 0x648   : > { %v1082_v44 = vmul.f32 1.442695, %v1079_v43 }
 0x649   : > { %v2052_v52 = vpop.permute.xlu1 %2051 }
 0x64a   : > { %2078 = vpow2.f32 %v1082_v44  ;;  %v2054_v54 = vunpack.i.h.bf16 %v2052_v52  ;;  %v2053_v55 = vunpack.i.l.bf16 %v2052_v52 }
 0x64b   : > { %v2077_v45 = vpop.eup %2076 }
 0x64c   : > { %v1084_v46 = vsel %vm501_vm3, %v2077_v45, 0.0  ;;  %v1908_v0 = vpack.c.bf16 %v2054_v54, %v2053_v55 }
 0x64d   : > { %1085 = vadd.xlane.f32.xlu0 %v1084_v46  ;;  %v2057_v5 = vpop.permute.xlu1 %2056 }
 0x64e   : > { %v2059_v11 = vunpack.i.h.bf16 %v2057_v5  ;;  %v2058_v14 = vunpack.i.l.bf16 %v2057_v5 }
 0x650   : > { %v1918_v15 = vpack.c.bf16 %v2059_v11, %v2058_v14 }
 0x654   : > { %v2079_v47 = vpop.eup %2078 }
 0x655   : > { %v1087_v48 = vsel %vm501_vm3, %v2079_v47, 0.0 }
 0x656   : > { %1088 = vadd.xlane.f32.xlu0 %v1087_v48 }
 0x6da   : > { %v1086_v51 = vpop.xlane.xlu0 %1085 }
 0x6db   : > { %2080 = vrcp.f32 %v1086_v51 }
 0x6e3   : > { %v1089_v53 = vpop.xlane.xlu0 %1088 }
 0x6e4   : > { %2082 = vrcp.f32 %v1089_v53 }
 0x6e5   : > { %v2081_v4 = vpop.eup %2080 }
 0x6e6   : > { %v1092_v8 = vmul.f32 %v2081_v4, %v2077_v45 }
 0x6ea   : > { %v1825_v56 = vpop.f32.mrb[2].mxu0 }
 0x6eb   : > { %v806_v58 = vpop.f32.mrb[3].mxu0  ;;  %v1861_v61 = vpop.f32.mrb[8].mxu1 }
 0x6ec   : > { %1828 = vmatprep.mubr.msk.f32.mxu0 %vm417_vm1, %v806_v58  ;;  %v1350_v63 = vpop.f32.mrb[9].mxu1  ;;  %v1356_v2 = vadd.f32 %v1861_v61, %v1267_v62 }
 0x6ed   : > { %v1351_v1 = vadd.f32 %v1350_v63, %v1266_v57  ;;  %1829 = vmatmul.mubr.msk.f32.vlgmr.msra.gmra.mrb[4].mxu0 %vm417_vm1, %v1825_v56 }
 0x6ee   : > { %1832 = vmatpush3.msra.mxu0 %v611_v50  ;;  %1833 = vmatprep.mubr.msk.f32.mxu0 %vm417_vm1, %v2615_v60  ;;  %v1362_v6 = vsel %vm501_vm3, %v1356_v2, -inf  ;;  %v2083_v7 = vpop.eup %2082 }
 0x6ef   : > { %1909 = vmatprep.subr.bf16.mxu0 %v1908_v0  ;;  %v1359_v3 = vsel %vm501_vm3, %v1351_v1, -inf  ;;  %v1093_v60 = vmul.f32 %v2083_v7, %v2079_v47 }
 0x6f0   : > { %1360 = vmax.xlane.f32.xlu0 %v1359_v3 }
 0x6f4   : > { %1363 = vmax.xlane.f32.xlu0 %v1362_v6 }
 0x6f5   : > { %1834 = vmatmul.mubr.msk.f32.vlgmr.msra.gmra.mrb[4].mxu0 %vm417_vm1, %v2613_v59 }
 0x6f6   : > { %1911 = vmatpush3.bf16.msra.mxu0 %v1908_v0  ;;  %1847 = vmatprep.mubr.msk.f32.mxu0 %vm501_vm3, %v1092_v8 }
 0x6f7   : > { %1850 = vmatprep.subr.mxu0 %v1181_v9 }
 0x6f9   : > { %1848 = vmatmul.mubr.msk.f32.vlgmr.msra.gmra.mrb[6].mxu0 %vm501_vm3, %v1093_v60 }
 0x6fa   : > { %1851 = vmatpush3.msra.mxu0 %v1181_v9 }
 0x6fb   : > { %1919 = vmatprep.subr.bf16.mxu0 %v1918_v15 }
 0x77d   : > { %v1361_v16 = vpop.xlane.xlu0 %1360 }
 0x77e   : > { %v1365_v18 = vsub.f32 %v1351_v1, %v1361_v16 }
 0x780   : > { %v1367_v19 = vmul.f32 1.442695, %v1365_v18 }
 0x781   : > { %v1364_v20 = vpop.xlane.xlu0 %1363 }
 0x782   : > { %2084 = vpow2.f32 %v1367_v19  ;;  %v1366_v21 = vsub.f32 %v1356_v2, %v1364_v20 }
 0x784   : > { %v1369_v22 = vmul.f32 1.442695, %v1366_v21 }
 0x786   : > { %2086 = vpow2.f32 %v1369_v22 }
 0x78c   : > { %v2085_v23 = vpop.eup %2084 }
 0x78d   : > { %v1371_v59 = vsel %vm501_vm3, %v2085_v23, 0.0 }
 0x78e   : > { %1372 = vadd.xlane.f32.xlu0 %v1371_v59 }
 0x790   : > { %v2087_v24 = vpop.eup %2086 }
 0x791   : > { %v1374_v25 = vsel %vm501_vm3, %v2087_v24, 0.0 }
 0x792   : > { %1375 = vadd.xlane.f32.xlu0 %v1374_v25 }
 0x7cc   : > { %v1849_v26 = vpop.f32.mrb[6].mxu0 }
 0x7cd   : > { %v1172_v27 = vpop.f32.mrb[7].mxu0 }
 0x7ce   : > { %1852 = vmatprep.mubr.msk.f32.mxu0 %vm417_vm1, %v1172_v27 }
 0x7cf   : > { %1853 = vmatmul.mubr.msk.f32.vlgmr.msra.gmra.mrb[4].mxu0 %vm417_vm1, %v1849_v26 }
 0x7d0   : > { %1921 = vmatpush3.bf16.msra.mxu0 %v1918_v15 }
 0x7d1   : > { %1869 = vmatprep.subr.mxu0 %v1468_v12 }
 0x81b   : > { %v1373_v10 = vpop.xlane.xlu0 %1372 }
 0x81c   : > { %2088 = vrcp.f32 %v1373_v10 }
 0x81f   : > { %v1376_v28 = vpop.xlane.xlu0 %1375 }
 0x820   : > { %2090 = vrcp.f32 %v1376_v28 }
 0x826   : > { %v2089_v29 = vpop.eup %2088 }
 0x827   : > { %v1379_v30 = vmul.f32 %v2089_v29, %v2085_v23 }
 0x829   : > { %1866 = vmatprep.mubr.msk.f32.mxu0 %vm501_vm3, %v1379_v30 }
 0x82a   : > { %v2091_v31 = vpop.eup %2090 }
 0x82b   : > { %v1380_v32 = vmul.f32 %v2091_v31, %v2087_v24 }
 0x82d   : > { %1867 = vmatmul.mubr.msk.f32.vlgmr.msra.gmra.mrb[8].mxu0 %vm501_vm3, %v1380_v32 }
 0x82e   : > { %1870 = vmatpush3.msra.mxu0 %v1468_v12 }
 0x900   : > { %v1868_v33 = vpop.f32.mrb[8].mxu0 }
 0x901   : > { %v1459_v34 = vpop.f32.mrb[9].mxu0 }
 0x902   : > { %1871 = vmatprep.mubr.msk.f32.mxu0 %vm417_vm1, %v1459_v34 }
 0x903   : > { %1872 = vmatmul.mubr.msk.f32.vlgmr.msra.gmra.mrb[4].mxu0 %vm417_vm1, %v1868_v33 }
 0x9d6   : > { %v1873_v13 = vpop.f32.mrb[4].mxu0 }
 0x9d7   : > { %v1560_v36 = vadd.f32 %v1873_v13, %v1729_v35  ;;  %v1541_v37 = vpop.f32.mrb[5].mxu0 }
 0x9d8   : > { %v1559_v38 = vadd.f32 %v1729_v35, %v1541_v37 }
 0x9d9   : > { %1562 = vst.msk [vmem:[%s313_s27 + $0x8] sm:$0xff] %vm327_vm0, %v1560_v36 }
 0x9da   : > { %1561 = vst.msk [vmem:[%s313_s27] sm:$0xff] %vm327_vm0, %v1559_v38 }
 0x9db   : > { %2219 = shalt.err (!%p2216_p4)
}
 0x9dc   : > { %s2220_s7 = scalar_lea.hbm %s2668_s16, 256  ;;  %s2224_s30 = scalar_lea.hbm %s2720_s6, 512 }
 0x9dd   : > { %p2221_p9 = scmp.ne.s32.totalorder %s2668_s16, %s2220_s7  ;;  %p2225_p8 = scmp.lt.u32.totalorder %s2668_s16, %s2720_s6 }
 0x9de   : > { %p2226_p13 = scmp.lt.u32.totalorder %s2224_s30, %s2220_s7  ;;  %p2228_p10 = scmp.lt.u32.totalorder %s2220_s7, %s2668_s16 }
 0x9df   : > { %p2222_p0 = pnand %p2221_p9, %p2491_p5 }
 0x9e0   : > { %p2227_p6 = por %p2226_p13, %p2225_p8 }
 0x9e1   : > { %p2223_p11 = pneg %p2222_p0 }
 0x9e2   : > { %p2229_p3 = por %p2228_p10, %p2227_p6 }
 0x9e4   : > { %p2230_p7 = pnand %p2229_p3, %p2223_p11 }
 0x9e6   : > { %2233 = shalt.err (!%p2230_p7)
}
 0x9e7   : > { %s2300_s10 = smov 128   ;;  %s2301_s8 = smov 8  }
 0x9e8   : > { %1942 = dma.vmem_to_hbm [thread:$0]  (%p2491_p5), %s2663_s29, 256, %s2668_s16, %s1564_s19, %s2300_s10, %s2300_s10, %s2301_s8  }
 0x9e9 PF: > { %s1592_s25 = sand.u32 1, %s2268_s21   ;;  %p2740_p12 = scmp.ne.s32.totalorder %s2725_s28, 0 }
 0x9ea   : > { %p2741_p1 = scmp.ge.s32.totalorder %s2280_s24, 2  ;;  %s1593_s17 = scalar_lea.sflag [#allocation4], %s1592_s25 }
 0x9ec   : > { %p1959_p2 = pnand %p2741_p1, %p2740_p12 }
 0x9ee   : > { %2263 = dma.done.wait (!%p1959_p2), %s1593_s17, 256  }
 0x9ef   : > { %2265 = vsyncadd (!%p1959_p2), %s1593_s17, 4294967040  ;;  %p21_p4 = scmp.ge.s32.totalorder %s2477_s18, 4   ;;  %s2742_s21 = smov %s2272_s22 }
 0x9f0   : > { %s2743_s22 = smov %s2276_s23  ;;  %s2744_s23 = smov %s2487_s14 }
 0x9f1   : > { %s2745_s24 = smov %s2477_s18  ;;  %23 = sbr.rel (!%p21_p4) target bundleno = 7 (0x7), region = 104 }
 0x9f8   :  { %1598 = vsyncpa [#allocation3], 1 }
 0x9f9   :  { %1600 = vsyncpa [#allocation3 + $0x1], 1 }
 0x9fa   :  { %1601 = vsyncpa [#allocation6], 1 }
 0x9fb   :  { %1602 = vsyncpa [#allocation9], 1 }
 0x9fc   :  { %1603 = vsyncpa [#allocation4], 1 }
 0x9fd   :  { %1605 = vsyncpa [#allocation4 + $0x1], 1 }

</bundles_post_ra>
